<compile_context>
chip_gen: v7x
topology: tpu7x:2x2x1
jax: 0.10.0
libtpu: 0.0.40
codegen_flags: <defaults>
</compile_context>

<pallas_src>
import functools

import jax
import jax.numpy as jnp
from jax import lax
from jax.experimental import pallas as pl
from jax.experimental.pallas import tpu as pltpu


def _early_fusion_push_kernel(x_ref, w_ref, b_ref, o_ref, acc_ref, *,
                              s0, s1, s_tile, first_blk, inv_len):
    # x_ref:   [b_tile, s_tile, H]   (native dtype)
    # w_ref:   [H, C_pad]
    # b_ref:   [1, C_pad]
    # o_ref:   [b_tile, C_pad]
    # acc_ref: [b_tile, H] f32 scratch (running sum over the segment)
    k = pl.program_id(1)

    @pl.when(k == 0)
    def _():
        acc_ref[...] = jnp.zeros_like(acc_ref)

    blk_start = (first_blk + k) * s_tile
    # Only the first / last covered blocks can straddle the segment boundary.
    is_boundary = jnp.logical_or(blk_start < s0, blk_start + s_tile > s1)

    @pl.when(jnp.logical_not(is_boundary))
    def _():
        # Interior block: fully inside [s0, s1); plain sum, no masking work.
        acc_ref[...] += jnp.sum(x_ref[...], axis=1, dtype=jnp.float32)

    @pl.when(is_boundary)
    def _():
        x = x_ref[...]  # native dtype
        # Per-row mask (1, s_tile, 1): one iota/compare per row, broadcast into
        # a single select.  Also masks any boundary-block overrun past S.
        row = lax.broadcasted_iota(jnp.int32, (1, s_tile, 1), 1) + blk_start
        mask = jnp.logical_and(row >= s0, row < s1)
        xm = jnp.where(mask, x, jnp.zeros_like(x))
        acc_ref[...] += jnp.sum(xm, axis=1, dtype=jnp.float32)

    @pl.when(k == pl.num_programs(1) - 1)
    def _():
        # Keep pooled sum in f32; upcast the small weight tile so the head
        # matmul matches the f32 reference even for bf16 inputs.
        w = w_ref[...].astype(jnp.float32)          # [H, C_pad]
        y = jnp.dot(acc_ref[...], w, preferred_element_type=jnp.float32)
        # Fold the 1/L mean scale into the small [b_tile, C_pad] result.
        y = y * inv_len + b_ref[...].astype(jnp.float32)
        o_ref[...] = y.astype(o_ref.dtype)


def _vmem_budgets():
    """Per-generation (x-buffer budget, vmem_limit_bytes)."""
    try:
        cap = int(pltpu.get_tpu_info().vmem_capacity_bytes)
    except Exception:
        cap = 64 * 1024 * 1024  # conservative (v7x-sized) fallback
    if cap >= 96 * 1024 * 1024:          # v5e / v6e: 128 MiB physical VMEM
        return 12 * 1024 * 1024, 64 * 1024 * 1024
    else:                                 # v7x: 64 MiB per TensorCore
        return 8 * 1024 * 1024, 48 * 1024 * 1024


def early_fusion_push(last_hidden_state, head_w, head_b, *, text_len,
                      push_modality, b_tile=None, s_tile=None):
    """last_hidden_state: [B, S, H]; head_w: [H, C]; head_b: [C] -> logits [B, C]."""
    B, S, H = last_hidden_state.shape
    Hw, C = head_w.shape
    assert Hw == H, "head weight must be stored as [hidden_dim, num_classes]"

    # --- segment selection (static) ------------------------------------------
    if push_modality == "text":
        s0, s1 = 0, min(text_len, S)
    elif push_modality == "image":
        s0, s1 = min(text_len, S), S
    else:
        raise ValueError("Error push modality is wrong")
    seg_len = max(s1 - s0, 0)
    # Empty segment -> NaN, matching torch.mean over an empty dim.
    inv_len = (1.0 / seg_len) if seg_len > 0 else float("nan")

    # --- pad class dim to a lane-dense multiple of 128 ------------------------
    C_pad = max(128, pl.cdiv(C, 128) * 128)
    if C_pad != C:
        head_w = jnp.pad(head_w, ((0, 0), (0, C_pad - C)))
        head_b = jnp.pad(head_b, ((0, C_pad - C),))
    head_b2 = head_b.reshape(1, C_pad)

    # --- tile sizes ------------------------------------------------------------
    itemsize = jnp.dtype(last_hidden_state.dtype).itemsize
    # Packed sublane tile: f32 -> 8, bf16 -> 16, int8/fp8 -> 32 rows per vreg.
    sublane = 8 * max(1, 4 // itemsize)

    if b_tile is None:
        # b_tile=8 only when it still yields >=2 batch blocks (v7x megacore);
        # otherwise keep the whole batch in one block.
        b_tile = 8 if B >= 16 else B
    b_tile = max(1, min(b_tile, B))

    x_budget, vmem_limit = _vmem_budgets()
    if s_tile is None:
        rows = max(1, x_budget // max(1, b_tile * H * itemsize))
        s_tile = min(S, rows)
    else:
        s_tile = min(S, s_tile)

    # Cap s_tile by the sublane-aligned hull of the segment so a short segment
    # never forces DMA of a huge, fully-masked tile.
    hull = pl.cdiv(max(s1, 1), sublane) * sublane - (s0 // sublane) * sublane
    hull = max(hull, sublane)
    s_tile = min(s_tile, hull)

    # Mosaic (8,128) rule: second-to-last block dim multiple of the packed
    # sublane tile, or equal to the full array dim.
    if s_tile != S:
        s_tile = max(sublane, (s_tile // sublane) * sublane)
        s_tile = min(s_tile, S)

    # --- grid covering only the aligned blocks spanning [s0, s1) --------------
    first_blk = s0 // s_tile
    num_s_blocks = max(pl.cdiv(s1, s_tile) - first_blk, 1)
    grid_b = pl.cdiv(B, b_tile)
    grid = (grid_b, num_s_blocks)

    kernel = functools.partial(
        _early_fusion_push_kernel,
        s0=s0, s1=s1, s_tile=s_tile, first_blk=first_blk, inv_len=inv_len)

    cost = pl.CostEstimate(
        flops=int(2 * B * H * C_pad + B * num_s_blocks * s_tile * H),
        transcendentals=0,
        bytes_accessed=int(
            B * num_s_blocks * s_tile * H * itemsize
            + H * C_pad * jnp.dtype(head_w.dtype).itemsize
            + C_pad * jnp.dtype(head_b.dtype).itemsize
            + B * C_pad * itemsize),
    )

    def _call(single_buffer_weights):
        # W / bias index_maps are constant -> resident; single-buffer them to
        # free VMEM for larger x tiles (matters most on v7x's 64 MiB VMEM).
        resident = ({"pipeline_mode": pl.Buffered(1)}
                    if single_buffer_weights else {})
        return pl.pallas_call(
            kernel,
            out_shape=jax.ShapeDtypeStruct((B, C_pad), last_hidden_state.dtype),
            grid_spec=pltpu.PrefetchScalarGridSpec(
                num_scalar_prefetch=0,
                grid=grid,
                in_specs=[
                    # x: only the segment's aligned S blocks are ever DMA'd.
                    pl.BlockSpec((b_tile, s_tile, H),
                                 lambda i, k: (i, first_blk + k, 0)),
                    pl.BlockSpec((H, C_pad), lambda i, k: (0, 0), **resident),
                    pl.BlockSpec((1, C_pad), lambda i, k: (0, 0), **resident),
                ],
                out_specs=pl.BlockSpec((b_tile, C_pad), lambda i, k: (i, 0)),
                scratch_shapes=[pltpu.VMEM((b_tile, H), jnp.float32)],
            ),
            compiler_params=pltpu.CompilerParams(
                dimension_semantics=("parallel", "arbitrary"),
                vmem_limit_bytes=vmem_limit,
            ),
            cost_estimate=cost,
        )(last_hidden_state, head_w, head_b2)

    try:
        out_padded = jax.block_until_ready(_call(True))
    except Exception:
        # This JAX build rejected pipeline_mode=Buffered(1); use default buffering.
        out_padded = _call(False)

    return out_padded[:, :C]


def _reference(last_hidden_state, head_w, head_b, *, text_len, push_modality):
    x = last_hidden_state.astype(jnp.float32)
    if push_modality == "text":
        seg = x[:, :text_len, :]
    else:
        seg = x[:, text_len:, :]
    pooled = jnp.mean(seg, axis=1)
    return (pooled @ head_w.astype(jnp.float32) + head_b.astype(jnp.float32)).astype(
        last_hidden_state.dtype
    )


if __name__ == "__main__":
    # Small, module-consistent shapes: batch=2, seq=8 (text_len=5 text tokens +
    # 3 image tokens), hidden_dim=32, num_classes=4.
    B, S, H, C = 2, 8, 32, 4
    TEXT_LEN = 5

    key = jax.random.PRNGKey(0)
    k_x, k_w, k_b = jax.random.split(key, 3)

    x = jax.random.normal(k_x, (B, S, H), dtype=jnp.float32)          # last_hidden_state
    # nn.Linear(hidden_dim, num_classes): torch weight is [C, H]; store transposed [H, C].
    head_w = jax.random.normal(k_w, (H, C), dtype=jnp.float32) * 0.02
    head_b = jax.random.normal(k_b, (C,), dtype=jnp.float32) * 0.02

    ok = True

    # f32 path: strict comparison for both modalities.
    for modality in ("text", "image"):
        out = early_fusion_push(
            x, head_w, head_b, text_len=TEXT_LEN, push_modality=modality
        )
        out = jax.block_until_ready(out)
        ref = _reference(x, head_w, head_b, text_len=TEXT_LEN, push_modality=modality)
        if out.shape != (B, C) or not jnp.allclose(out, ref, atol=1e-5, rtol=1e-5):
            ok = False

    # bf16 smoke test (exercises packed-sublane tiling and the f32-head path);
    # loose tolerance to account for bf16 input/output rounding.
    x_bf = x.astype(jnp.bfloat16)
    w_bf = head_w.astype(jnp.bfloat16)
    b_bf = head_b.astype(jnp.bfloat16)
    out_bf = early_fusion_push(
        x_bf, w_bf, b_bf, text_len=TEXT_LEN, push_modality="text"
    )
    out_bf = jax.block_until_ready(out_bf)
    ref_bf = _reference(x_bf, w_bf, b_bf, text_len=TEXT_LEN, push_modality="text")
    if out_bf.shape != (B, C) or not jnp.allclose(
        out_bf.astype(jnp.float32), ref_bf.astype(jnp.float32), atol=3e-2, rtol=3e-2
    ):
        ok = False

    if ok:
        print("KERNEL_OK")
</pallas_src>

<mosaic_0001>
module attributes {stable_mosaic.version = 11 : i64} {
  func.func @_early_fusion_push_kernel(%arg0: i32, %arg1: i32, %arg2: memref<2x8x32xf32, #tpu.memory_space<vmem>>, %arg3: memref<32x128xf32, #tpu.memory_space<vmem>>, %arg4: memref<1x128xf32, #tpu.memory_space<vmem>>, %arg5: memref<2x128xf32, #tpu.memory_space<vmem>>, %arg6: memref<2x32xf32, #tpu.memory_space<vmem>>) attributes {dimension_semantics = [#tpu.dimension_semantics<parallel>, #tpu.dimension_semantics<arbitrary>], iteration_bounds = array<i64: 1, 1>, scalar_prefetch = 0 : i64, scratch_operands = 1 : i64, tpu.core_type = #tpu.core_type<tc>, window_params = [{transform_indices = @transform_0, window_bounds = array<i64: 2, 8, 32>}, {pipeline_mode = #tpu.pipeline_mode<synchronous>, transform_indices = @transform_1, window_bounds = array<i64: 32, 128>}, {pipeline_mode = #tpu.pipeline_mode<synchronous>, transform_indices = @transform_2, window_bounds = array<i64: 1, 128>}, {transform_indices = @transform_3, window_bounds = array<i64: 2, 128>}]} {
    %c0_i32 = arith.constant 0 : i32
    %0 = arith.cmpi eq, %arg1, %c0_i32 : i32
    %1 = arith.extui %0 : i1 to i32
    %c0_i32_0 = arith.constant 0 : i32
    %2 = arith.cmpi ne, %1, %c0_i32_0 : i32
    scf.if %2 {
      %cst = arith.constant 0.000000e+00 : f32
      %17 = vector.broadcast %cst : f32 to vector<2x32xf32>
      %c0 = arith.constant 0 : index
      %c0_8 = arith.constant 0 : index
      %18 = vector.load %arg6[%c0, %c0_8] : memref<2x32xf32, #tpu.memory_space<vmem>>, vector<2x32xf32>
      tpu.vector_store %arg6[%c0, %c0_8], %17 {strides = array<i32>} : memref<2x32xf32, #tpu.memory_space<vmem>>, vector<2x32xf32>,
    } else {
    }
    %c0_i32_1 = arith.constant 0 : i32
    %3 = arith.addi %c0_i32_1, %arg1 : i32
    %c8_i32 = arith.constant 8 : i32
    %4 = arith.muli %3, %c8_i32 : i32
    %c0_i32_2 = arith.constant 0 : i32
    %5 = arith.cmpi slt, %4, %c0_i32_2 : i32
    %c8_i32_3 = arith.constant 8 : i32
    %6 = arith.addi %4, %c8_i32_3 : i32
    %c5_i32 = arith.constant 5 : i32
    %7 = arith.cmpi sgt, %6, %c5_i32 : i32
    %8 = arith.ori %5, %7 : i1
    %true = arith.constant true
    %9 = arith.xori %8, %true : i1
    %10 = arith.extui %9 : i1 to i32
    %c0_i32_4 = arith.constant 0 : i32
    %11 = arith.cmpi ne, %10, %c0_i32_4 : i32
    scf.if %11 {
      %c0 = arith.constant 0 : index
      %c0_8 = arith.constant 0 : index
      %17 = vector.load %arg6[%c0, %c0_8] : memref<2x32xf32, #tpu.memory_space<vmem>>, vector<2x32xf32>
      %c0_9 = arith.constant 0 : index
      %c0_10 = arith.constant 0 : index
      %c0_11 = arith.constant 0 : index
      %18 = vector.load %arg2[%c0_9, %c0_10, %c0_11] : memref<2x8x32xf32, #tpu.memory_space<vmem>>, vector<2x8x32xf32>
      %cst = arith.constant dense<0.000000e+00> : vector<2x32xf32>
      %19 = vector.multi_reduction <add>, %18, %cst [1] : vector<2x8x32xf32> to vector<2x32xf32>
      %20 = arith.addf %17, %19 : vector<2x32xf32>
      %c0_12 = arith.constant 0 : index
      %c0_13 = arith.constant 0 : index
      %21 = vector.load %arg6[%c0_12, %c0_13] : memref<2x32xf32, #tpu.memory_space<vmem>>, vector<2x32xf32>
      tpu.vector_store %arg6[%c0_12, %c0_13], %20 {strides = array<i32>} : memref<2x32xf32, #tpu.memory_space<vmem>>, vector<2x32xf32>,
    } else {
    }
    %12 = arith.extui %8 : i1 to i32
    %c0_i32_5 = arith.constant 0 : i32
    %13 = arith.cmpi ne, %12, %c0_i32_5 : i32
    scf.if %13 {
      %c0 = arith.constant 0 : index
      %c0_8 = arith.constant 0 : index
      %c0_9 = arith.constant 0 : index
      %17 = vector.load %arg2[%c0, %c0_8, %c0_9] : memref<2x8x32xf32, #tpu.memory_space<vmem>>, vector<2x8x32xf32>
      %18 = tpu.iota {dimensions = array<i32: 1>} : vector<1x8x1xi32>
      %19 = vector.broadcast %4 : i32 to vector<1x8x1xi32>
      %20 = arith.addi %18, %19 : vector<1x8x1xi32>
      %c0_i32_10 = arith.constant 0 : i32
      %21 = vector.broadcast %c0_i32_10 : i32 to vector<1x8x1xi32>
      %22 = arith.cmpi sge, %20, %21 : vector<1x8x1xi32>
      %c5_i32_11 = arith.constant 5 : i32
      %23 = vector.broadcast %c5_i32_11 : i32 to vector<1x8x1xi32>
      %24 = arith.cmpi slt, %20, %23 : vector<1x8x1xi32>
      %25 = arith.andi %22, %24 : vector<1x8x1xi1>
      %cst = arith.constant 0.000000e+00 : f32
      %26 = vector.broadcast %cst : f32 to vector<2x8x32xf32>
      %27 = vector.shape_cast %25 : vector<1x8x1xi1> to vector<1x8x1xi1>
      %28 = vector.broadcast %27 : vector<1x8x1xi1> to vector<2x8x32xi1>
      %29 = arith.select %28, %17, %26 : vector<2x8x32xi1>, vector<2x8x32xf32>
      %c0_12 = arith.constant 0 : index
      %c0_13 = arith.constant 0 : index
      %30 = vector.load %arg6[%c0_12, %c0_13] : memref<2x32xf32, #tpu.memory_space<vmem>>, vector<2x32xf32>
      %cst_14 = arith.constant dense<0.000000e+00> : vector<2x32xf32>
      %31 = vector.multi_reduction <add>, %29, %cst_14 [1] : vector<2x8x32xf32> to vector<2x32xf32>
      %32 = arith.addf %30, %31 : vector<2x32xf32>
      %c0_15 = arith.constant 0 : index
      %c0_16 = arith.constant 0 : index
      %33 = vector.load %arg6[%c0_15, %c0_16] : memref<2x32xf32, #tpu.memory_space<vmem>>, vector<2x32xf32>
      tpu.vector_store %arg6[%c0_15, %c0_16], %32 {strides = array<i32>} : memref<2x32xf32, #tpu.memory_space<vmem>>, vector<2x32xf32>,
    } else {
    }
    %c0_i32_6 = arith.constant 0 : i32
    %14 = arith.cmpi eq, %arg1, %c0_i32_6 : i32
    %15 = arith.extui %14 : i1 to i32
    %c0_i32_7 = arith.constant 0 : i32
    %16 = arith.cmpi ne, %15, %c0_i32_7 : i32
    scf.if %16 {
      %c0 = arith.constant 0 : index
      %c0_8 = arith.constant 0 : index
      %17 = vector.load %arg3[%c0, %c0_8] : memref<32x128xf32, #tpu.memory_space<vmem>>, vector<32x128xf32>
      %c0_9 = arith.constant 0 : index
      %c0_10 = arith.constant 0 : index
      %18 = vector.load %arg6[%c0_9, %c0_10] : memref<2x32xf32, #tpu.memory_space<vmem>>, vector<2x32xf32>
      %cst = arith.constant dense<0.000000e+00> : vector<2x128xf32>
      %19 = tpu.matmul %18, %17, %cst {dimension_numbers = #tpu.dot_dimension_numbers<[1], [0], [0], [1], [0, 0, 1, 1], [], []>} : vector<2x32xf32>, vector<32x128xf32>, vector<2x128xf32> -> vector<2x128xf32>
      %cst_11 = arith.constant 2.000000e-01 : f32
      %20 = vector.broadcast %cst_11 : f32 to vector<2x128xf32>
      %21 = arith.mulf %19, %20 : vector<2x128xf32>
      %c0_12 = arith.constant 0 : index
      %c0_13 = arith.constant 0 : index
      %22 = vector.load %arg4[%c0_12, %c0_13] : memref<1x128xf32, #tpu.memory_space<vmem>>, vector<1x128xf32>
      %23 = vector.broadcast %22 : vector<1x128xf32> to vector<2x128xf32>
      %24 = arith.addf %21, %23 : vector<2x128xf32>
      %c0_14 = arith.constant 0 : index
      %c0_15 = arith.constant 0 : index
      %25 = vector.load %arg5[%c0_14, %c0_15] : memref<2x128xf32, #tpu.memory_space<vmem>>, vector<2x128xf32>
      tpu.vector_store %arg5[%c0_14, %c0_15], %24 {strides = array<i32>} : memref<2x128xf32, #tpu.memory_space<vmem>>, vector<2x128xf32>,
    } else {
    }
    return
  }
  func.func @transform_0(%arg0: i32, %arg1: i32) -> (i32, i32, i32) {
    %c0_i32 = arith.constant 0 : i32
    %0 = arith.addi %c0_i32, %arg1 : i32
    %c0_i32_0 = arith.constant 0 : i32
    %c0_i32_1 = arith.constant 0 : i32
    return %arg0, %0, %c0_i32_0 : i32, i32, i32
  }
  func.func @transform_1(%arg0: i32, %arg1: i32) -> (i32, i32) {
    %c0_i32 = arith.constant 0 : i32
    %c0_i32_0 = arith.constant 0 : i32
    %c0_i32_1 = arith.constant 0 : i32
    return %c0_i32, %c0_i32_0 : i32, i32
  }
  func.func @transform_2(%arg0: i32, %arg1: i32) -> (i32, i32) {
    %c0_i32 = arith.constant 0 : i32
    %c0_i32_0 = arith.constant 0 : i32
    %c0_i32_1 = arith.constant 0 : i32
    return %c0_i32, %c0_i32_0 : i32, i32
  }
  func.func @transform_3(%arg0: i32, %arg1: i32) -> (i32, i32) {
    %c0_i32 = arith.constant 0 : i32
    %c0_i32_0 = arith.constant 0 : i32
    return %arg0, %c0_i32 : i32, i32
  }
}

module attributes {stable_mosaic.version = 11 : i64} {
  func.func @_early_fusion_push_kernel(%arg0: i32, %arg1: i32, %arg2: memref<2x8x32xf32, #tpu.memory_space<vmem>>, %arg3: memref<32x128xf32, #tpu.memory_space<vmem>>, %arg4: memref<1x128xf32, #tpu.memory_space<vmem>>, %arg5: memref<2x128xf32, #tpu.memory_space<vmem>>, %arg6: memref<2x32xf32, #tpu.memory_space<vmem>>) attributes {dimension_semantics = [#tpu.dimension_semantics<parallel>, #tpu.dimension_semantics<arbitrary>], iteration_bounds = array<i64: 1, 1>, scalar_prefetch = 0 : i64, scratch_operands = 1 : i64, tpu.core_type = #tpu.core_type<tc>, window_params = [{transform_indices = @transform_0, window_bounds = array<i64: 2, 8, 32>}, {pipeline_mode = #tpu.pipeline_mode<synchronous>, transform_indices = @transform_1, window_bounds = array<i64: 32, 128>}, {pipeline_mode = #tpu.pipeline_mode<synchronous>, transform_indices = @transform_2, window_bounds = array<i64: 1, 128>}, {transform_indices = @transform_3, window_bounds = array<i64: 2, 128>}]} {
    %c0_i32 = arith.constant 0 : i32
    %0 = arith.cmpi eq, %arg1, %c0_i32 : i32
    %1 = arith.extui %0 : i1 to i32
    %c0_i32_0 = arith.constant 0 : i32
    %2 = arith.cmpi ne, %1, %c0_i32_0 : i32
    scf.if %2 {
      %cst = arith.constant 0.000000e+00 : f32
      %17 = vector.broadcast %cst : f32 to vector<2x32xf32>
      %c0 = arith.constant 0 : index
      %c0_8 = arith.constant 0 : index
      %18 = vector.load %arg6[%c0, %c0_8] : memref<2x32xf32, #tpu.memory_space<vmem>>, vector<2x32xf32>
      tpu.vector_store %arg6[%c0, %c0_8], %17 {strides = array<i32>} : memref<2x32xf32, #tpu.memory_space<vmem>>, vector<2x32xf32>,
    } else {
    }
    %c0_i32_1 = arith.constant 0 : i32
    %3 = arith.addi %c0_i32_1, %arg1 : i32
    %c8_i32 = arith.constant 8 : i32
    %4 = arith.muli %3, %c8_i32 : i32
    %c0_i32_2 = arith.constant 0 : i32
    %5 = arith.cmpi slt, %4, %c0_i32_2 : i32
    %c8_i32_3 = arith.constant 8 : i32
    %6 = arith.addi %4, %c8_i32_3 : i32
    %c5_i32 = arith.constant 5 : i32
    %7 = arith.cmpi sgt, %6, %c5_i32 : i32
    %8 = arith.ori %5, %7 : i1
    %true = arith.constant true
    %9 = arith.xori %8, %true : i1
    %10 = arith.extui %9 : i1 to i32
    %c0_i32_4 = arith.constant 0 : i32
    %11 = arith.cmpi ne, %10, %c0_i32_4 : i32
    scf.if %11 {
      %c0 = arith.constant 0 : index
      %c0_8 = arith.constant 0 : index
      %17 = vector.load %arg6[%c0, %c0_8] : memref<2x32xf32, #tpu.memory_space<vmem>>, vector<2x32xf32>
      %c0_9 = arith.constant 0 : index
      %c0_10 = arith.constant 0 : index
      %c0_11 = arith.constant 0 : index
      %18 = vector.load %arg2[%c0_9, %c0_10, %c0_11] : memref<2x8x32xf32, #tpu.memory_space<vmem>>, vector<2x8x32xf32>
      %cst = arith.constant dense<0.000000e+00> : vector<2x32xf32>
      %19 = vector.multi_reduction <add>, %18, %cst [1] : vector<2x8x32xf32> to vector<2x32xf32>
      %20 = arith.addf %17, %19 : vector<2x32xf32>
      %c0_12 = arith.constant 0 : index
      %c0_13 = arith.constant 0 : index
      %21 = vector.load %arg6[%c0_12, %c0_13] : memref<2x32xf32, #tpu.memory_space<vmem>>, vector<2x32xf32>
      tpu.vector_store %arg6[%c0_12, %c0_13], %20 {strides = array<i32>} : memref<2x32xf32, #tpu.memory_space<vmem>>, vector<2x32xf32>,
    } else {
    }
    %12 = arith.extui %8 : i1 to i32
    %c0_i32_5 = arith.constant 0 : i32
    %13 = arith.cmpi ne, %12, %c0_i32_5 : i32
    scf.if %13 {
      %c0 = arith.constant 0 : index
      %c0_8 = arith.constant 0 : index
      %c0_9 = arith.constant 0 : index
      %17 = vector.load %arg2[%c0, %c0_8, %c0_9] : memref<2x8x32xf32, #tpu.memory_space<vmem>>, vector<2x8x32xf32>
      %18 = tpu.iota {dimensions = array<i32: 1>} : vector<1x8x1xi32>
      %19 = vector.broadcast %4 : i32 to vector<1x8x1xi32>
      %20 = arith.addi %18, %19 : vector<1x8x1xi32>
      %c0_i32_10 = arith.constant 0 : i32
      %21 = vector.broadcast %c0_i32_10 : i32 to vector<1x8x1xi32>
      %22 = arith.cmpi sge, %20, %21 : vector<1x8x1xi32>
      %c5_i32_11 = arith.constant 5 : i32
      %23 = vector.broadcast %c5_i32_11 : i32 to vector<1x8x1xi32>
      %24 = arith.cmpi slt, %20, %23 : vector<1x8x1xi32>
      %25 = arith.andi %22, %24 : vector<1x8x1xi1>
      %cst = arith.constant 0.000000e+00 : f32
      %26 = vector.broadcast %cst : f32 to vector<2x8x32xf32>
      %27 = vector.shape_cast %25 : vector<1x8x1xi1> to vector<1x8x1xi1>
      %28 = vector.broadcast %27 : vector<1x8x1xi1> to vector<2x8x32xi1>
      %29 = arith.select %28, %17, %26 : vector<2x8x32xi1>, vector<2x8x32xf32>
      %c0_12 = arith.constant 0 : index
      %c0_13 = arith.constant 0 : index
      %30 = vector.load %arg6[%c0_12, %c0_13] : memref<2x32xf32, #tpu.memory_space<vmem>>, vector<2x32xf32>
      %cst_14 = arith.constant dense<0.000000e+00> : vector<2x32xf32>
      %31 = vector.multi_reduction <add>, %29, %cst_14 [1] : vector<2x8x32xf32> to vector<2x32xf32>
      %32 = arith.addf %30, %31 : vector<2x32xf32>
      %c0_15 = arith.constant 0 : index
      %c0_16 = arith.constant 0 : index
      %33 = vector.load %arg6[%c0_15, %c0_16] : memref<2x32xf32, #tpu.memory_space<vmem>>, vector<2x32xf32>
      tpu.vector_store %arg6[%c0_15, %c0_16], %32 {strides = array<i32>} : memref<2x32xf32, #tpu.memory_space<vmem>>, vector<2x32xf32>,
    } else {
    }
    %c0_i32_6 = arith.constant 0 : i32
    %14 = arith.cmpi eq, %arg1, %c0_i32_6 : i32
    %15 = arith.extui %14 : i1 to i32
    %c0_i32_7 = arith.constant 0 : i32
    %16 = arith.cmpi ne, %15, %c0_i32_7 : i32
    scf.if %16 {
      %c0 = arith.constant 0 : index
      %c0_8 = arith.constant 0 : index
      %17 = vector.load %arg3[%c0, %c0_8] : memref<32x128xf32, #tpu.memory_space<vmem>>, vector<32x128xf32>
      %c0_9 = arith.constant 0 : index
      %c0_10 = arith.constant 0 : index
      %18 = vector.load %arg6[%c0_9, %c0_10] : memref<2x32xf32, #tpu.memory_space<vmem>>, vector<2x32xf32>
      %cst = arith.constant dense<0.000000e+00> : vector<2x128xf32>
      %19 = tpu.matmul %18, %17, %cst {dimension_numbers = #tpu.dot_dimension_numbers<[1], [0], [0], [1], [0, 0, 1, 1], [], []>} : vector<2x32xf32>, vector<32x128xf32>, vector<2x128xf32> -> vector<2x128xf32>
      %cst_11 = arith.constant 2.000000e-01 : f32
      %20 = vector.broadcast %cst_11 : f32 to vector<2x128xf32>
      %21 = arith.mulf %19, %20 : vector<2x128xf32>
      %c0_12 = arith.constant 0 : index
      %c0_13 = arith.constant 0 : index
      %22 = vector.load %arg4[%c0_12, %c0_13] : memref<1x128xf32, #tpu.memory_space<vmem>>, vector<1x128xf32>
      %23 = vector.broadcast %22 : vector<1x128xf32> to vector<2x128xf32>
      %24 = arith.addf %21, %23 : vector<2x128xf32>
      %c0_14 = arith.constant 0 : index
      %c0_15 = arith.constant 0 : index
      %25 = vector.load %arg5[%c0_14, %c0_15] : memref<2x128xf32, #tpu.memory_space<vmem>>, vector<2x128xf32>
      tpu.vector_store %arg5[%c0_14, %c0_15], %24 {strides = array<i32>} : memref<2x128xf32, #tpu.memory_space<vmem>>, vector<2x128xf32>,
    } else {
    }
    return
  }
  func.func @transform_0(%arg0: i32, %arg1: i32) -> (i32, i32, i32) {
    %c0_i32 = arith.constant 0 : i32
    %0 = arith.addi %c0_i32, %arg1 : i32
    %c0_i32_0 = arith.constant 0 : i32
    %c0_i32_1 = arith.constant 0 : i32
    return %arg0, %0, %c0_i32_0 : i32, i32, i32
  }
  func.func @transform_1(%arg0: i32, %arg1: i32) -> (i32, i32) {
    %c0_i32 = arith.constant 0 : i32
    %c0_i32_0 = arith.constant 0 : i32
    %c0_i32_1 = arith.constant 0 : i32
    return %c0_i32, %c0_i32_0 : i32, i32
  }
  func.func @transform_2(%arg0: i32, %arg1: i32) -> (i32, i32) {
    %c0_i32 = arith.constant 0 : i32
    %c0_i32_0 = arith.constant 0 : i32
    %c0_i32_1 = arith.constant 0 : i32
    return %c0_i32, %c0_i32_0 : i32, i32
  }
  func.func @transform_3(%arg0: i32, %arg1: i32) -> (i32, i32) {
    %c0_i32 = arith.constant 0 : i32
    %c0_i32_0 = arith.constant 0 : i32
    return %arg0, %c0_i32 : i32, i32
  }
}

</mosaic_0001>

<bundles_post_ra>
// kernel: tpu_custom_call.1
= control target key start
LH: loop header
LB: loop body
LE: loop exit
PB: predicated region body
PF: predicated region fallthrough
CT: control target
= control target key end

     0   :  { %8 = vsyncpa [#allocation4], 0  ;;  %s407_s0 = inlined_call_operand.hbm [shape: f32[2,8,32], index: 0, kind: input, shape index: {}]   ;;  %s408_s1 = inlined_call_operand.hbm [shape: f32[32,128], index: 1, kind: input, shape index: {}]   ;;  %s409_s2 = inlined_call_operand.vmem [shape: f32[1,128], index: 2, kind: input, shape index: {}]   ;;  %s410_s3 = inlined_call_operand.hbm [shape: f32[2,128], index: 3, kind: output, shape index: {}]  }
   0x1   :  { %9 = vsyncpa [#allocation7], 0 }
   0x2   :  { %10 = vsyncpa [#allocation5], 0  ;;  %s335_s12 = smov [#allocation3]   ;;  %s263_s16 = scalar_lea.hbm %s407_s0, 256 }
   0x3   :  { %s16_s13 = sshll.u32 %s335_s12, 4  ;;  %p264_p0 = scmp.ne.s32.totalorder %s407_s0, %s263_s16  ;;  %s17_s13 = int_to_ptr.vmem [resolvable:$true] %s16_s13 }
   0x4   :  { %p267_p1 = scmp.lt.u32.totalorder %s263_s16, %s407_s0 }
   0x6   :  { %p269_p2 = pnand %p267_p1, %p264_p0 }
   0x8   :  { %272 = shalt.err (!%p269_p2)
}
   0x9   :  { %s273_s21 = scalar_lea.vmem %s17_s13, 256  ;;  %p278_p4 = scmp.lt.s32.totalorder %s17_s13, %s17_s13 }
   0xa   :  { %p274_p3 = scmp.ne.s32.totalorder %s17_s13, %s273_s21  ;;  %p279_p5 = scmp.lt.s32.totalorder %s273_s21, %s273_s21 }
   0xc   :  { %p280_p6 = por %p279_p5, %p278_p4 }
   0xe   :  { %p281_p7 = pnand %p280_p6, %p274_p3 }
  0x10   :  { %284 = shalt.err (!%p281_p7)
}
  0x11   :  { %s336_s22 = smov 128   ;;  %s337_s23 = smov 8  }
  0x12   :  { %22 = dma.hbm_to_vmem [thread:$0]  %s407_s0, 256, %s17_s13, [#allocation4], %s336_s22, %s336_s22, %s337_s23  }
  0x13   :  { %s338_s26 = smov [#allocation6]   ;;  %s285_s30 = scalar_lea.hbm %s408_s1, 512 }
  0x14   :  { %s28_s27 = sshll.u32 %s338_s26, 4  ;;  %p286_p8 = scmp.ne.s32.totalorder %s408_s1, %s285_s30  ;;  %s29_s27 = int_to_ptr.vmem [resolvable:$true] %s28_s27 }
  0x15   :  { %p289_p9 = scmp.lt.u32.totalorder %s285_s30, %s408_s1 }
  0x17   :  { %p291_p10 = pnand %p289_p9, %p286_p8 }
  0x19   :  { %294 = shalt.err (!%p291_p10)
}
  0x1a   :  { %s295_s8 = scalar_lea.vmem %s29_s27, 512  ;;  %p300_p12 = scmp.lt.s32.totalorder %s29_s27, %s29_s27 }
  0x1b   :  { %p296_p11 = scmp.ne.s32.totalorder %s29_s27, %s295_s8  ;;  %p301_p13 = scmp.lt.s32.totalorder %s295_s8, %s295_s8 }
  0x1d   :  { %p302_p0 = por %p301_p13, %p300_p12 }
  0x1f   :  { %p303_p1 = pnand %p302_p0, %p296_p11 }
  0x21   :  { %306 = shalt.err (!%p303_p1)
}
  0x22   :  { %34 = dma.hbm_to_vmem [thread:$0]  %s408_s1, 512, %s29_s27, [#allocation7], %s336_s22, %s336_s22, %s337_s23  }
  0x23   :  { %329 = dma.done.wait [#allocation4], 256  }
  0x24   :  { %330 = vsyncadd [#allocation4], 4294967040 }
  0x25   :  { %331 = dma.done.wait [#allocation7], 512  }
  0x26   :  { %332 = vsyncadd [#allocation7], 4294966784  ;;  %vm47_vm0 = vcmask 254976   ;;  %v339_v0 = vmov 0.0|0.0   ;;  %v340_v1 = vmov 0.0   ;;  %vm341_vm1 = vmmov 0  }
  0x27   :  { %249 = vmatprep.subr.bf16.mxu0 %v339_v0  ;;  %48 = vst.msk [vmem:[#allocation2] sm:$0x3] %vm47_vm0, %v340_v1  ;;  %246 = vmatprep.mubr.msk.f32.mxu0 %vm341_vm1, %v340_v1  ;;  %v59_v2 = vlaneseq  ;;  %v126_v4 = vld [vmem:[#allocation6] sm:$0xff]  ;;  %v127_v5 = vld [vmem:[#allocation6 + $0x8] sm:$0xff]  ;;  %v128_v6 = vld [vmem:[#allocation6 + $0x10] sm:$0xff]  ;;  %vm71_vm3 = vcmask 261120  }
  0x28   :  { %v250_v7 = vpack.c.bf16 %v127_v5, %v126_v4  ;;  %v129_v8 = vld [vmem:[#allocation6 + $0x18] sm:$0xff]  ;;  %v57_v9 = vld [vmem:[#allocation3] sm:$0xff]  ;;  %vm88_vm4 = vcmask 1041409   ;;  %v232_v33 = vld [vmem:[%s409_s2] ss:$0 sm:$0xff]  ;;  %s342_s11 = smov [#allocation8]  }
  0x29   :  { %v60_v3 = vshrl.u32 %v59_v2, 7  ;;  %v58_v10 = vld [vmem:[#allocation3 + $0x8] sm:$0xff]  ;;  %v253_v13 = vpack.c.bf16 %v129_v8, %v128_v6  ;;  %s221_s12 = sshll.u32 %s342_s11, 4  ;;  %s222_s12 = int_to_ptr.vmem [resolvable:$true] %s221_s12 }
  0x2a   :  { %251 = vmatpush3.bf16.msra.mxu0 %v250_v7  ;;  %s307_s13 = scalar_lea.vmem %s222_s12, 32  ;;  %p312_p3 = scmp.lt.s32.totalorder %s222_s12, %s222_s12 }
  0x2b   :  { %vm64_vm2 = vcmp.lt.s32.totalorder %v60_v3, 5  ;;  %252 = vmatprep.subr.bf16.mxu0 %v339_v0  ;;  %p308_p2 = scmp.ne.s32.totalorder %s222_s12, %s307_s13  ;;  %p313_p4 = scmp.lt.s32.totalorder %s307_s13, %s307_s13 }
  0x2c   :  { %v68_v11 = vsel %vm64_vm2, %v57_v9, 0.0  ;;  %v69_v12 = vsel %vm64_vm2, %v58_v10, 0.0 }
  0x2d   :  { %v72_v14 = vsel %vm71_vm3, %v68_v11, 0.0  ;;  %v79_v15 = vsel %vm71_vm3, %v69_v12, 0.0  ;;  %p314_p5 = por %p313_p4, %p312_p3 }
  0x2e   :  { %v73_v16 = vrot.slane %v72_v14, 4  ;;  %v80_v17 = vrot.slane %v79_v15, 4  ;;  %254 = vmatpush3.bf16.msra.mxu0 %v253_v13  ;;  %v70_v26 = vld [vmem:[#allocation2] sm:$0x3] }
  0x2f   :  { %p315_p6 = pnand %p314_p5, %p308_p2 }
  0x30   :  { %v74_v18 = vadd.f32 %v73_v16, %v72_v14  ;;  %v81_v19 = vadd.f32 %v80_v17, %v79_v15 }
  0x32   :  { %v75_v20 = vrot.slane %v74_v18, 2  ;;  %v82_v21 = vrot.slane %v81_v19, 2 }
  0x34   :  { %v76_v22 = vadd.f32 %v75_v20, %v74_v18  ;;  %v83_v23 = vadd.f32 %v82_v21, %v81_v19 }
  0x36   :  { %v77_v24 = vrot.slane %v76_v22, 1  ;;  %v84_v25 = vrot.slane %v83_v23, 1 }
  0x38   :  { %v78_v27 = vadd.f32 %v77_v24, %v76_v22  ;;  %v85_v28 = vadd.f32 %v84_v25, %v83_v23 }
  0x3a   :  { %v89_v29 = vsel %vm88_vm4, %v85_v28, %v78_v27 }
  0x3b   :  { %v91_v30 = vadd.f32 %v89_v29, %v70_v26 }
  0x3d   :  { %93 = vst.msk [vmem:[#allocation2] sm:$0x3] %vm47_vm0, %v91_v30 }
  0x44   :  { %v130_v31 = vld [vmem:[#allocation2] sm:$0x3] }
  0x45   :  { %247 = vmatmul.mubr.msk.f32.vlgmr.msra.gmra.mrb[0].mxu0 %vm71_vm3, %v130_v31 }
 0x118   :  { %v201_v32 = vpop.f32.mrb[0].mxu0 }
 0x119   :  { %v205_v34 = vmul.f32 0.2, %v201_v32  ;;  %v248_v35 = vpop.f32.mrb[1].mxu0 }
 0x11b   :  { %v213_v36 = vadd.f32 %v232_v33, %v205_v34 }
 0x11d   :  { %214 = vst [vmem:[#allocation8] sm:$0x3] %v213_v36 }
 0x11e   :  { %318 = shalt.err (!%p315_p6)
}
 0x11f   :  { %s319_s16 = scalar_lea.hbm %s410_s3, 32 }
 0x120   :  { %p320_p7 = scmp.ne.s32.totalorder %s410_s3, %s319_s16  ;;  %p323_p8 = scmp.lt.u32.totalorder %s319_s16, %s410_s3 }
 0x122   :  { %p325_p9 = pnand %p323_p8, %p320_p7 }
 0x124   :  { %328 = shalt.err (!%p325_p9)
}
 0x125   :  { %224 = dma.vmem_to_hbm [thread:$0]  %s222_s12, 32, %s410_s3, [#allocation5]  }
 0x126   :  { %333 = dma.done.wait [#allocation5], 32  }
 0x127   :  { %334 = vsyncadd [#allocation5], 4294967264 }
 0x128   :  { %228 = vsyncpa [#allocation4], 1 }
 0x129   :  { %229 = vsyncpa [#allocation7], 1 }
 0x12a   :  { %230 = vsyncpa [#allocation5], 1 }

// kernel: tpu_custom_call.1
= control target key start
LH: loop header
LB: loop body
LE: loop exit
PB: predicated region body
PF: predicated region fallthrough
CT: control target
= control target key end

     0   :  { %8 = vsyncpa [#allocation4], 0  ;;  %s407_s0 = inlined_call_operand.hbm [shape: f32[2,8,32], index: 0, kind: input, shape index: {}]   ;;  %s408_s1 = inlined_call_operand.hbm [shape: f32[32,128], index: 1, kind: input, shape index: {}]   ;;  %s409_s2 = inlined_call_operand.vmem [shape: f32[1,128], index: 2, kind: input, shape index: {}]   ;;  %s410_s3 = inlined_call_operand.hbm [shape: f32[2,128], index: 3, kind: output, shape index: {}]  }
   0x1   :  { %9 = vsyncpa [#allocation7], 0 }
   0x2   :  { %10 = vsyncpa [#allocation5], 0  ;;  %s335_s12 = smov [#allocation3]   ;;  %s263_s16 = scalar_lea.hbm %s407_s0, 256 }
   0x3   :  { %s16_s13 = sshll.u32 %s335_s12, 4  ;;  %p264_p0 = scmp.ne.s32.totalorder %s407_s0, %s263_s16  ;;  %s17_s13 = int_to_ptr.vmem [resolvable:$true] %s16_s13 }
   0x4   :  { %p267_p1 = scmp.lt.u32.totalorder %s263_s16, %s407_s0 }
   0x6   :  { %p269_p2 = pnand %p267_p1, %p264_p0 }
   0x8   :  { %272 = shalt.err (!%p269_p2)
}
   0x9   :  { %s273_s21 = scalar_lea.vmem %s17_s13, 256  ;;  %p278_p4 = scmp.lt.s32.totalorder %s17_s13, %s17_s13 }
   0xa   :  { %p274_p3 = scmp.ne.s32.totalorder %s17_s13, %s273_s21  ;;  %p279_p5 = scmp.lt.s32.totalorder %s273_s21, %s273_s21 }
   0xc   :  { %p280_p6 = por %p279_p5, %p278_p4 }
   0xe   :  { %p281_p7 = pnand %p280_p6, %p274_p3 }
  0x10   :  { %284 = shalt.err (!%p281_p7)
}
  0x11   :  { %s336_s22 = smov 128   ;;  %s337_s23 = smov 8  }
  0x12   :  { %22 = dma.hbm_to_vmem [thread:$0]  %s407_s0, 256, %s17_s13, [#allocation4], %s336_s22, %s336_s22, %s337_s23  }
  0x13   :  { %s338_s26 = smov [#allocation6]   ;;  %s285_s30 = scalar_lea.hbm %s408_s1, 512 }
  0x14   :  { %s28_s27 = sshll.u32 %s338_s26, 4  ;;  %p286_p8 = scmp.ne.s32.totalorder %s408_s1, %s285_s30  ;;  %s29_s27 = int_to_ptr.vmem [resolvable:$true] %s28_s27 }
  0x15   :  { %p289_p9 = scmp.lt.u32.totalorder %s285_s30, %s408_s1 }
  0x17   :  { %p291_p10 = pnand %p289_p9, %p286_p8 }
  0x19   :  { %294 = shalt.err (!%p291_p10)
}
  0x1a   :  { %s295_s8 = scalar_lea.vmem %s29_s27, 512  ;;  %p300_p12 = scmp.lt.s32.totalorder %s29_s27, %s29_s27 }
  0x1b   :  { %p296_p11 = scmp.ne.s32.totalorder %s29_s27, %s295_s8  ;;  %p301_p13 = scmp.lt.s32.totalorder %s295_s8, %s295_s8 }
  0x1d   :  { %p302_p0 = por %p301_p13, %p300_p12 }
  0x1f   :  { %p303_p1 = pnand %p302_p0, %p296_p11 }
  0x21   :  { %306 = shalt.err (!%p303_p1)
}
  0x22   :  { %34 = dma.hbm_to_vmem [thread:$0]  %s408_s1, 512, %s29_s27, [#allocation7], %s336_s22, %s336_s22, %s337_s23  }
  0x23   :  { %329 = dma.done.wait [#allocation4], 256  }
  0x24   :  { %330 = vsyncadd [#allocation4], 4294967040 }
  0x25   :  { %331 = dma.done.wait [#allocation7], 512  }
  0x26   :  { %332 = vsyncadd [#allocation7], 4294966784  ;;  %vm47_vm0 = vcmask 254976   ;;  %v339_v0 = vmov 0.0|0.0   ;;  %v340_v1 = vmov 0.0   ;;  %vm341_vm1 = vmmov 0  }
  0x27   :  { %249 = vmatprep.subr.bf16.mxu0 %v339_v0  ;;  %48 = vst.msk [vmem:[#allocation2] sm:$0x3] %vm47_vm0, %v340_v1  ;;  %246 = vmatprep.mubr.msk.f32.mxu0 %vm341_vm1, %v340_v1  ;;  %v59_v2 = vlaneseq  ;;  %v126_v4 = vld [vmem:[#allocation6] sm:$0xff]  ;;  %v127_v5 = vld [vmem:[#allocation6 + $0x8] sm:$0xff]  ;;  %v128_v6 = vld [vmem:[#allocation6 + $0x10] sm:$0xff]  ;;  %vm71_vm3 = vcmask 261120  }
  0x28   :  { %v250_v7 = vpack.c.bf16 %v127_v5, %v126_v4  ;;  %v129_v8 = vld [vmem:[#allocation6 + $0x18] sm:$0xff]  ;;  %v57_v9 = vld [vmem:[#allocation3] sm:$0xff]  ;;  %vm88_vm4 = vcmask 1041409   ;;  %v232_v33 = vld [vmem:[%s409_s2] ss:$0 sm:$0xff]  ;;  %s342_s11 = smov [#allocation8]  }
  0x29   :  { %v60_v3 = vshrl.u32 %v59_v2, 7  ;;  %v58_v10 = vld [vmem:[#allocation3 + $0x8] sm:$0xff]  ;;  %v253_v13 = vpack.c.bf16 %v129_v8, %v128_v6  ;;  %s221_s12 = sshll.u32 %s342_s11, 4  ;;  %s222_s12 = int_to_ptr.vmem [resolvable:$true] %s221_s12 }
  0x2a   :  { %251 = vmatpush3.bf16.msra.mxu0 %v250_v7  ;;  %s307_s13 = scalar_lea.vmem %s222_s12, 32  ;;  %p312_p3 = scmp.lt.s32.totalorder %s222_s12, %s222_s12 }
  0x2b   :  { %vm64_vm2 = vcmp.lt.s32.totalorder %v60_v3, 5  ;;  %252 = vmatprep.subr.bf16.mxu0 %v339_v0  ;;  %p308_p2 = scmp.ne.s32.totalorder %s222_s12, %s307_s13  ;;  %p313_p4 = scmp.lt.s32.totalorder %s307_s13, %s307_s13 }
  0x2c   :  { %v68_v11 = vsel %vm64_vm2, %v57_v9, 0.0  ;;  %v69_v12 = vsel %vm64_vm2, %v58_v10, 0.0 }
  0x2d   :  { %v72_v14 = vsel %vm71_vm3, %v68_v11, 0.0  ;;  %v79_v15 = vsel %vm71_vm3, %v69_v12, 0.0  ;;  %p314_p5 = por %p313_p4, %p312_p3 }
  0x2e   :  { %v73_v16 = vrot.slane %v72_v14, 4  ;;  %v80_v17 = vrot.slane %v79_v15, 4  ;;  %254 = vmatpush3.bf16.msra.mxu0 %v253_v13  ;;  %v70_v26 = vld [vmem:[#allocation2] sm:$0x3] }
  0x2f   :  { %p315_p6 = pnand %p314_p5, %p308_p2 }
  0x30   :  { %v74_v18 = vadd.f32 %v73_v16, %v72_v14  ;;  %v81_v19 = vadd.f32 %v80_v17, %v79_v15 }
  0x32   :  { %v75_v20 = vrot.slane %v74_v18, 2  ;;  %v82_v21 = vrot.slane %v81_v19, 2 }
  0x34   :  { %v76_v22 = vadd.f32 %v75_v20, %v74_v18  ;;  %v83_v23 = vadd.f32 %v82_v21, %v81_v19 }
  0x36   :  { %v77_v24 = vrot.slane %v76_v22, 1  ;;  %v84_v25 = vrot.slane %v83_v23, 1 }
  0x38   :  { %v78_v27 = vadd.f32 %v77_v24, %v76_v22  ;;  %v85_v28 = vadd.f32 %v84_v25, %v83_v23 }
  0x3a   :  { %v89_v29 = vsel %vm88_vm4, %v85_v28, %v78_v27 }
  0x3b   :  { %v91_v30 = vadd.f32 %v89_v29, %v70_v26 }
  0x3d   :  { %93 = vst.msk [vmem:[#allocation2] sm:$0x3] %vm47_vm0, %v91_v30 }
  0x44   :  { %v130_v31 = vld [vmem:[#allocation2] sm:$0x3] }
  0x45   :  { %247 = vmatmul.mubr.msk.f32.vlgmr.msra.gmra.mrb[0].mxu0 %vm71_vm3, %v130_v31 }
 0x118   :  { %v201_v32 = vpop.f32.mrb[0].mxu0 }
 0x119   :  { %v205_v34 = vmul.f32 0.2, %v201_v32  ;;  %v248_v35 = vpop.f32.mrb[1].mxu0 }
 0x11b   :  { %v213_v36 = vadd.f32 %v232_v33, %v205_v34 }
 0x11d   :  { %214 = vst [vmem:[#allocation8] sm:$0x3] %v213_v36 }
 0x11e   :  { %318 = shalt.err (!%p315_p6)
}
 0x11f   :  { %s319_s16 = scalar_lea.hbm %s410_s3, 32 }
 0x120   :  { %p320_p7 = scmp.ne.s32.totalorder %s410_s3, %s319_s16  ;;  %p323_p8 = scmp.lt.u32.totalorder %s319_s16, %s410_s3 }
 0x122   :  { %p325_p9 = pnand %p323_p8, %p320_p7 }
 0x124   :  { %328 = shalt.err (!%p325_p9)
}
 0x125   :  { %224 = dma.vmem_to_hbm [thread:$0]  %s222_s12, 32, %s410_s3, [#allocation5]  }
 0x126   :  { %333 = dma.done.wait [#allocation5], 32  }
 0x127   :  { %334 = vsyncadd [#allocation5], 4294967264 }
 0x128   :  { %228 = vsyncpa [#allocation4], 1 }
 0x129   :  { %229 = vsyncpa [#allocation7], 1 }
 0x12a   :  { %230 = vsyncpa [#allocation5], 1 }

</bundles_post_ra>
